<compile_context>
chip_gen: v6e
topology: v6e:2x2x1
jax: 0.10.0
libtpu: 0.0.40
codegen_flags: <defaults>
</compile_context>

<pallas_src>
import functools
import math

import numpy as np

import jax
import jax.numpy as jnp
from jax.experimental import pallas as pl
from jax.experimental.pallas import tpu as pltpu


def _round_up(x: int, m: int) -> int:
    return ((x + m - 1) // m) * m


def _pe_kernel(x_ref, freq_ref, off_ref, o_ref, xt_ref, *,
               g: int, dim: int, reps: int):
    """One row-tile.

    x_ref:    [T, g*dim]        packed input rows (g original rows per row)
    freq_ref: [1, g*out_dim]    per-column fused frequency (2*pi*2^octave)
    off_ref:  [1, g*out_dim]    per-column phase offset (0 for sin, pi/2 cos)
    o_ref:    [T, g*out_dim]    packed output rows
    xt_ref:   [T, g*out_dim]    f32 scratch holding the replicated channels
    """
    out_dim = reps * dim

    # Spread each packed row-group's `dim` channels to its out_dim-wide window
    # and replicate them `reps` times using log2(reps) doubling slice-copies.
    # Only static ref slice loads/stores are used (robust lowering, exact).
    for k in range(g):
        base = k * out_dim
        xt_ref[:, base:base + dim] = x_ref[:, k * dim:(k + 1) * dim].astype(
            jnp.float32)
        filled = dim
        while filled < out_dim:
            cp = min(filled, out_dim - filled)   # always a multiple of dim
            xt_ref[:, base + filled:base + filled + cp] = (
                xt_ref[:, base:base + cp])
            filled += cp

    xt = xt_ref[...]                                   # (T, g*out_dim) f32
    out = jnp.sin(xt * freq_ref[...] + off_ref[...])   # single transcendental
    o_ref[...] = out.astype(o_ref.dtype)               # one lane-dense store


def positional_encoding(samples: jax.Array, num_octaves: int, *,
                        tile_rows=None, out_dtype=None) -> jax.Array:
    """JAX/Pallas equivalent of PositionalEncoding.forward.

    samples: float array of shape (*batch, dim)
    returns: array of shape (*batch, dim * num_octaves * 2)
    """
    *batch, dim = map(int, samples.shape)
    reps = 2 * num_octaves
    out_dim = dim * reps
    if out_dtype is None:
        out_dtype = samples.dtype

    n_rows = 1
    for b in batch:
        n_rows *= int(b)
    n_rows = max(n_rows, 1)

    # ---- lane packing factor: pack g rows per vreg row so the minor dim of
    # the compute/store tile is (close to) a multiple of 128 lanes.
    g = 128 // math.gcd(out_dim, 128)
    g = max(1, min(g, 16))
    W = g * out_dim
    gdim = g * dim

    rows_p = _round_up(n_rows, g)
    x2d = samples.reshape(n_rows, dim)
    if rows_p != n_rows:
        x2d = jnp.pad(x2d, ((0, rows_p - n_rows), (0, 0)))
    R = rows_p // g
    xp = x2d.reshape(R, gdim)        # free row-major reshape

    # ---- per-column constants (passed as inputs; Pallas forbids captured
    # array constants inside the kernel body).
    col = np.arange(W)
    j = col % out_dim
    r = j // dim                      # chunk index: even -> sin, odd -> cos
    octave = r // 2
    # 2*pi*2^i is an exact power-of-two scaling of fl32(pi) -> phases are
    # bit-identical to ((x * 2**i) * 2 * pi) of the reference.
    freq = (2.0 * np.pi * np.exp2(octave)).astype(np.float32)[None, :]
    off = ((r % 2) * (np.pi / 2.0)).astype(np.float32)[None, :]

    # ---- tile sizing: account for double-buffered I/O tiles, the f32
    # scratch and ~3 live full-width f32 temporaries; target ~12 MiB so we
    # stay well inside a 32 MiB scoped-VMEM limit on every generation.
    in_isz = np.dtype(x2d.dtype).itemsize
    out_isz = np.dtype(out_dtype).itemsize
    per_row = W * (2 * out_isz + 4 + 3 * 4) + 2 * gdim * in_isz
    if tile_rows is None:
        budget = 12 * 1024 * 1024
        tile_rows = max(8, min(2048, budget // per_row))
        # keep >= ~8 grid steps for megacore/v7x sharding on large inputs,
        # but never drop below 256 packed rows per tile.
        tile_rows = min(tile_rows, max(256, _round_up(pl.cdiv(R, 8), 8)))
    tile_rows = max(8, (int(tile_rows) // 8) * 8)
    if np.dtype(out_dtype).itemsize == 2:
        tile_rows = max(16, (tile_rows // 16) * 16)
    if tile_rows >= R:
        tile_rows = R                 # full-extent block (always legal)

    grid = (pl.cdiv(R, tile_rows),)   # ragged tail masked by Pallas

    kernel = functools.partial(_pe_kernel, g=g, dim=dim, reps=reps)

    out_p = pl.pallas_call(
        kernel,
        out_shape=jax.ShapeDtypeStruct((R, W), out_dtype),
        grid=grid,
        in_specs=[
            pl.BlockSpec((tile_rows, gdim), lambda i: (i, 0)),
            pl.BlockSpec((1, W), lambda i: (0, 0)),
            pl.BlockSpec((1, W), lambda i: (0, 0)),
        ],
        out_specs=pl.BlockSpec((tile_rows, W), lambda i: (i, 0)),
        scratch_shapes=[pltpu.VMEM((tile_rows, W), jnp.float32)],
        compiler_params=pltpu.CompilerParams(
            dimension_semantics=("parallel",),
            vmem_limit_bytes=32 * 1024 * 1024),
    )(xp, jnp.asarray(freq), jnp.asarray(off))

    out2d = out_p.reshape(rows_p, out_dim)
    if rows_p != n_rows:
        out2d = out2d[:n_rows]
    return out2d.reshape(*batch, out_dim)


def positional_encoding_ref(samples: jax.Array, num_octaves: int) -> jax.Array:
    """Pure-JAX reference mirroring the torch loop."""
    parts = []
    for i in range(num_octaves):
        freq = 2 ** i
        parts.append(jnp.sin(samples * freq * 2.0 * jnp.pi))
        parts.append(jnp.cos(samples * freq * 2.0 * jnp.pi))
    return jnp.concatenate(parts, axis=-1)


if __name__ == "__main__":
    num_octaves = 4
    key = jax.random.PRNGKey(0)
    # (*batch, dim) = (2, 8, 4) -> output (2, 8, 32)
    x = jax.random.uniform(key, (2, 8, 4), dtype=jnp.float32)

    out = jax.block_until_ready(positional_encoding(x, num_octaves))
    ref = positional_encoding_ref(x, num_octaves)
    assert out.shape == (2, 8, num_octaves * 2 * 4), out.shape
    assert out.dtype == x.dtype, out.dtype
    # cos columns use sin(phase + pi/2); at |phase| ~ 2*pi*2^i this differs
    # from jnp.cos by ~1 ulp of the phase, hence 1e-4 (not 2e-5) tolerance.
    assert jnp.allclose(out, ref, atol=1e-4, rtol=1e-5), "mismatch vs reference"

    # Second case: ragged row count, odd channel dim, more octaves
    # (exercises row padding for the packing factor and unaligned out_dim).
    x2 = jax.random.uniform(jax.random.PRNGKey(1), (3, 50, 3), dtype=jnp.float32)
    out2 = jax.block_until_ready(positional_encoding(x2, 6))
    ref2 = positional_encoding_ref(x2, 6)
    assert out2.shape == (3, 50, 3 * 6 * 2), out2.shape
    assert jnp.allclose(out2, ref2, atol=1e-4, rtol=1e-5), "mismatch (ragged case)"

    print("KERNEL_OK")
</pallas_src>

<mosaic_0001>
module attributes {stable_mosaic.version = 11 : i64} {
  func.func @_pe_kernel(%arg0: i32, %arg1: memref<4x16xf32, #tpu.memory_space<vmem>>, %arg2: memref<1x128xf32, #tpu.memory_space<vmem>>, %arg3: memref<1x128xf32, #tpu.memory_space<vmem>>, %arg4: memref<4x128xf32, #tpu.memory_space<vmem>>, %arg5: memref<4x128xf32, #tpu.memory_space<vmem>>) attributes {dimension_semantics = [#tpu.dimension_semantics<parallel>], iteration_bounds = array<i64: 1>, scalar_prefetch = 0 : i64, scratch_operands = 1 : i64, tpu.core_type = #tpu.core_type<tc>, window_params = [{transform_indices = @transform_0, window_bounds = array<i64: 4, 16>}, {pipeline_mode = #tpu.pipeline_mode<synchronous>, transform_indices = @transform_1, window_bounds = array<i64: 1, 128>}, {pipeline_mode = #tpu.pipeline_mode<synchronous>, transform_indices = @transform_2, window_bounds = array<i64: 1, 128>}, {transform_indices = @transform_3, window_bounds = array<i64: 4, 128>}]} {
    %c0 = arith.constant 0 : index
    %c0_0 = arith.constant 0 : index
    %0 = vector.load %arg1[%c0, %c0_0] : memref<4x16xf32, #tpu.memory_space<vmem>>, vector<4x4xf32>
    %c0_1 = arith.constant 0 : index
    %c0_2 = arith.constant 0 : index
    %1 = vector.load %arg5[%c0_1, %c0_2] : memref<4x128xf32, #tpu.memory_space<vmem>>, vector<4x4xf32>
    tpu.vector_store %arg5[%c0_1, %c0_2], %0 {strides = array<i32>} : memref<4x128xf32, #tpu.memory_space<vmem>>, vector<4x4xf32>,
    %c0_3 = arith.constant 0 : index
    %c0_4 = arith.constant 0 : index
    %2 = vector.load %arg5[%c0_3, %c0_4] : memref<4x128xf32, #tpu.memory_space<vmem>>, vector<4x4xf32>
    %c0_5 = arith.constant 0 : index
    %c4 = arith.constant 4 : index
    %3 = vector.load %arg5[%c0_5, %c4] : memref<4x128xf32, #tpu.memory_space<vmem>>, vector<4x4xf32>
    tpu.vector_store %arg5[%c0_5, %c4], %2 {strides = array<i32>} : memref<4x128xf32, #tpu.memory_space<vmem>>, vector<4x4xf32>,
    %c0_6 = arith.constant 0 : index
    %c0_7 = arith.constant 0 : index
    %4 = vector.load %arg5[%c0_6, %c0_7] : memref<4x128xf32, #tpu.memory_space<vmem>>, vector<4x8xf32>
    %c0_8 = arith.constant 0 : index
    %c8 = arith.constant 8 : index
    %5 = vector.load %arg5[%c0_8, %c8] : memref<4x128xf32, #tpu.memory_space<vmem>>, vector<4x8xf32>
    tpu.vector_store %arg5[%c0_8, %c8], %4 {strides = array<i32>} : memref<4x128xf32, #tpu.memory_space<vmem>>, vector<4x8xf32>,
    %c0_9 = arith.constant 0 : index
    %c0_10 = arith.constant 0 : index
    %6 = vector.load %arg5[%c0_9, %c0_10] : memref<4x128xf32, #tpu.memory_space<vmem>>, vector<4x16xf32>
    %c0_11 = arith.constant 0 : index
    %c16 = arith.constant 16 : index
    %7 = vector.load %arg5[%c0_11, %c16] : memref<4x128xf32, #tpu.memory_space<vmem>>, vector<4x16xf32>
    tpu.vector_store %arg5[%c0_11, %c16], %6 {strides = array<i32>} : memref<4x128xf32, #tpu.memory_space<vmem>>, vector<4x16xf32>,
    %c0_12 = arith.constant 0 : index
    %c4_13 = arith.constant 4 : index
    %8 = vector.load %arg1[%c0_12, %c4_13] : memref<4x16xf32, #tpu.memory_space<vmem>>, vector<4x4xf32>
    %c0_14 = arith.constant 0 : index
    %c32 = arith.constant 32 : index
    %9 = vector.load %arg5[%c0_14, %c32] : memref<4x128xf32, #tpu.memory_space<vmem>>, vector<4x4xf32>
    tpu.vector_store %arg5[%c0_14, %c32], %8 {strides = array<i32>} : memref<4x128xf32, #tpu.memory_space<vmem>>, vector<4x4xf32>,
    %c0_15 = arith.constant 0 : index
    %c32_16 = arith.constant 32 : index
    %10 = vector.load %arg5[%c0_15, %c32_16] : memref<4x128xf32, #tpu.memory_space<vmem>>, vector<4x4xf32>
    %c0_17 = arith.constant 0 : index
    %c36 = arith.constant 36 : index
    %11 = vector.load %arg5[%c0_17, %c36] : memref<4x128xf32, #tpu.memory_space<vmem>>, vector<4x4xf32>
    tpu.vector_store %arg5[%c0_17, %c36], %10 {strides = array<i32>} : memref<4x128xf32, #tpu.memory_space<vmem>>, vector<4x4xf32>,
    %c0_18 = arith.constant 0 : index
    %c32_19 = arith.constant 32 : index
    %12 = vector.load %arg5[%c0_18, %c32_19] : memref<4x128xf32, #tpu.memory_space<vmem>>, vector<4x8xf32>
    %c0_20 = arith.constant 0 : index
    %c40 = arith.constant 40 : index
    %13 = vector.load %arg5[%c0_20, %c40] : memref<4x128xf32, #tpu.memory_space<vmem>>, vector<4x8xf32>
    tpu.vector_store %arg5[%c0_20, %c40], %12 {strides = array<i32>} : memref<4x128xf32, #tpu.memory_space<vmem>>, vector<4x8xf32>,
    %c0_21 = arith.constant 0 : index
    %c32_22 = arith.constant 32 : index
    %14 = vector.load %arg5[%c0_21, %c32_22] : memref<4x128xf32, #tpu.memory_space<vmem>>, vector<4x16xf32>
    %c0_23 = arith.constant 0 : index
    %c48 = arith.constant 48 : index
    %15 = vector.load %arg5[%c0_23, %c48] : memref<4x128xf32, #tpu.memory_space<vmem>>, vector<4x16xf32>
    tpu.vector_store %arg5[%c0_23, %c48], %14 {strides = array<i32>} : memref<4x128xf32, #tpu.memory_space<vmem>>, vector<4x16xf32>,
    %c0_24 = arith.constant 0 : index
    %c8_25 = arith.constant 8 : index
    %16 = vector.load %arg1[%c0_24, %c8_25] : memref<4x16xf32, #tpu.memory_space<vmem>>, vector<4x4xf32>
    %c0_26 = arith.constant 0 : index
    %c64 = arith.constant 64 : index
    %17 = vector.load %arg5[%c0_26, %c64] : memref<4x128xf32, #tpu.memory_space<vmem>>, vector<4x4xf32>
    tpu.vector_store %arg5[%c0_26, %c64], %16 {strides = array<i32>} : memref<4x128xf32, #tpu.memory_space<vmem>>, vector<4x4xf32>,
    %c0_27 = arith.constant 0 : index
    %c64_28 = arith.constant 64 : index
    %18 = vector.load %arg5[%c0_27, %c64_28] : memref<4x128xf32, #tpu.memory_space<vmem>>, vector<4x4xf32>
    %c0_29 = arith.constant 0 : index
    %c68 = arith.constant 68 : index
    %19 = vector.load %arg5[%c0_29, %c68] : memref<4x128xf32, #tpu.memory_space<vmem>>, vector<4x4xf32>
    tpu.vector_store %arg5[%c0_29, %c68], %18 {strides = array<i32>} : memref<4x128xf32, #tpu.memory_space<vmem>>, vector<4x4xf32>,
    %c0_30 = arith.constant 0 : index
    %c64_31 = arith.constant 64 : index
    %20 = vector.load %arg5[%c0_30, %c64_31] : memref<4x128xf32, #tpu.memory_space<vmem>>, vector<4x8xf32>
    %c0_32 = arith.constant 0 : index
    %c72 = arith.constant 72 : index
    %21 = vector.load %arg5[%c0_32, %c72] : memref<4x128xf32, #tpu.memory_space<vmem>>, vector<4x8xf32>
    tpu.vector_store %arg5[%c0_32, %c72], %20 {strides = array<i32>} : memref<4x128xf32, #tpu.memory_space<vmem>>, vector<4x8xf32>,
    %c0_33 = arith.constant 0 : index
    %c64_34 = arith.constant 64 : index
    %22 = vector.load %arg5[%c0_33, %c64_34] : memref<4x128xf32, #tpu.memory_space<vmem>>, vector<4x16xf32>
    %c0_35 = arith.constant 0 : index
    %c80 = arith.constant 80 : index
    %23 = vector.load %arg5[%c0_35, %c80] : memref<4x128xf32, #tpu.memory_space<vmem>>, vector<4x16xf32>
    tpu.vector_store %arg5[%c0_35, %c80], %22 {strides = array<i32>} : memref<4x128xf32, #tpu.memory_space<vmem>>, vector<4x16xf32>,
    %c0_36 = arith.constant 0 : index
    %c12 = arith.constant 12 : index
    %24 = vector.load %arg1[%c0_36, %c12] : memref<4x16xf32, #tpu.memory_space<vmem>>, vector<4x4xf32>
    %c0_37 = arith.constant 0 : index
    %c96 = arith.constant 96 : index
    %25 = vector.load %arg5[%c0_37, %c96] : memref<4x128xf32, #tpu.memory_space<vmem>>, vector<4x4xf32>
    tpu.vector_store %arg5[%c0_37, %c96], %24 {strides = array<i32>} : memref<4x128xf32, #tpu.memory_space<vmem>>, vector<4x4xf32>,
    %c0_38 = arith.constant 0 : index
    %c96_39 = arith.constant 96 : index
    %26 = vector.load %arg5[%c0_38, %c96_39] : memref<4x128xf32, #tpu.memory_space<vmem>>, vector<4x4xf32>
    %c0_40 = arith.constant 0 : index
    %c100 = arith.constant 100 : index
    %27 = vector.load %arg5[%c0_40, %c100] : memref<4x128xf32, #tpu.memory_space<vmem>>, vector<4x4xf32>
    tpu.vector_store %arg5[%c0_40, %c100], %26 {strides = array<i32>} : memref<4x128xf32, #tpu.memory_space<vmem>>, vector<4x4xf32>,
    %c0_41 = arith.constant 0 : index
    %c96_42 = arith.constant 96 : index
    %28 = vector.load %arg5[%c0_41, %c96_42] : memref<4x128xf32, #tpu.memory_space<vmem>>, vector<4x8xf32>
    %c0_43 = arith.constant 0 : index
    %c104 = arith.constant 104 : index
    %29 = vector.load %arg5[%c0_43, %c104] : memref<4x128xf32, #tpu.memory_space<vmem>>, vector<4x8xf32>
    tpu.vector_store %arg5[%c0_43, %c104], %28 {strides = array<i32>} : memref<4x128xf32, #tpu.memory_space<vmem>>, vector<4x8xf32>,
    %c0_44 = arith.constant 0 : index
    %c96_45 = arith.constant 96 : index
    %30 = vector.load %arg5[%c0_44, %c96_45] : memref<4x128xf32, #tpu.memory_space<vmem>>, vector<4x16xf32>
    %c0_46 = arith.constant 0 : index
    %c112 = arith.constant 112 : index
    %31 = vector.load %arg5[%c0_46, %c112] : memref<4x128xf32, #tpu.memory_space<vmem>>, vector<4x16xf32>
    tpu.vector_store %arg5[%c0_46, %c112], %30 {strides = array<i32>} : memref<4x128xf32, #tpu.memory_space<vmem>>, vector<4x16xf32>,
    %c0_47 = arith.constant 0 : index
    %c0_48 = arith.constant 0 : index
    %32 = vector.load %arg5[%c0_47, %c0_48] : memref<4x128xf32, #tpu.memory_space<vmem>>, vector<4x128xf32>
    %c0_49 = arith.constant 0 : index
    %c0_50 = arith.constant 0 : index
    %33 = vector.load %arg2[%c0_49, %c0_50] : memref<1x128xf32, #tpu.memory_space<vmem>>, vector<1x128xf32>
    %34 = vector.broadcast %33 : vector<1x128xf32> to vector<4x128xf32>
    %35 = arith.mulf %32, %34 : vector<4x128xf32>
    %c0_51 = arith.constant 0 : index
    %c0_52 = arith.constant 0 : index
    %36 = vector.load %arg3[%c0_51, %c0_52] : memref<1x128xf32, #tpu.memory_space<vmem>>, vector<1x128xf32>
    %37 = vector.broadcast %36 : vector<1x128xf32> to vector<4x128xf32>
    %38 = arith.addf %35, %37 : vector<4x128xf32>
    %39 = math.sin %38 : vector<4x128xf32>
    %c0_53 = arith.constant 0 : index
    %c0_54 = arith.constant 0 : index
    %40 = vector.load %arg4[%c0_53, %c0_54] : memref<4x128xf32, #tpu.memory_space<vmem>>, vector<4x128xf32>
    tpu.vector_store %arg4[%c0_53, %c0_54], %39 {strides = array<i32>} : memref<4x128xf32, #tpu.memory_space<vmem>>, vector<4x128xf32>,
    return
  }
  func.func @transform_0(%arg0: i32) -> (i32, i32) {
    %c0_i32 = arith.constant 0 : i32
    %c0_i32_0 = arith.constant 0 : i32
    return %arg0, %c0_i32 : i32, i32
  }
  func.func @transform_1(%arg0: i32) -> (i32, i32) {
    %c0_i32 = arith.constant 0 : i32
    %c0_i32_0 = arith.constant 0 : i32
    %c0_i32_1 = arith.constant 0 : i32
    return %c0_i32, %c0_i32_0 : i32, i32
  }
  func.func @transform_2(%arg0: i32) -> (i32, i32) {
    %c0_i32 = arith.constant 0 : i32
    %c0_i32_0 = arith.constant 0 : i32
    %c0_i32_1 = arith.constant 0 : i32
    return %c0_i32, %c0_i32_0 : i32, i32
  }
  func.func @transform_3(%arg0: i32) -> (i32, i32) {
    %c0_i32 = arith.constant 0 : i32
    %c0_i32_0 = arith.constant 0 : i32
    return %arg0, %c0_i32 : i32, i32
  }
}

</mosaic_0001>

<bundles_post_ra>
// kernel: tpu_custom_call.1
= control target key start
LH: loop header
LB: loop body
LE: loop exit
PB: predicated region body
PF: predicated region fallthrough
CT: control target
= control target key end

     0   :  { %8 = vsyncpa [#allocation4], 0  ;;  %s423_s0 = inlined_call_operand.hbm [shape: f32[4,16], index: 0, kind: input, shape index: {}]   ;;  %s424_s1 = inlined_call_operand.vmem [shape: f32[1,128], index: 1, kind: input, shape index: {}]   ;;  %s425_s2 = inlined_call_operand.vmem [shape: f32[1,128], index: 2, kind: input, shape index: {}]   ;;  %s426_s3 = inlined_call_operand.hbm [shape: f32[4,128], index: 3, kind: output, shape index: {}]  }
   0x1   :  { %9 = vsyncpa [#allocation5], 0  ;;  %s344_s12 = smov [#allocation3]  }
   0x2   :  { %s16_s13 = sshll.u32 %s344_s12, 4  ;;  %s17_s13 = int_to_ptr.vmem [resolvable:$true] %s16_s13 }
   0x3   :  { %s308_s14 = scalar_lea.vmem %s17_s13, 64  ;;  %p313_p1 = scmp.lt.s32.totalorder %s17_s13, %s17_s13 }
   0x4   :  { %p309_p0 = scmp.ne.s32.totalorder %s17_s13, %s308_s14  ;;  %p314_p2 = scmp.lt.s32.totalorder %s308_s14, %s308_s14 }
   0x6   :  { %p315_p3 = por %p314_p2, %p313_p1 }
   0x8   :  { %p316_p4 = pnand %p315_p3, %p309_p0 }
   0xa   :  { %319 = shalt.err (!%p316_p4)
}
   0xb   :  { %19 = dma.hbm_to_vmem [thread:$0]  %s423_s0, 64, %s17_s13, [#allocation4]  }
   0xc   :  { %340 = dma.done.wait [#allocation4], 64  }
   0xd   :  { %341 = vsyncadd [#allocation4], 4294967232  ;;  %vm28_vm0 = vcmask 27648   ;;  %v27_v0 = vld [vmem:[#allocation3] sm:$0xf]  ;;  %s345_s17 = smov 4  }
   0xe   :  { %29 = vst.msk [vmem:[#allocation2] sm:$0xf] %vm28_vm0, %v27_v0  ;;  %vm35_vm1 = vcmask 60448   ;;  %s346_s18 = smov 8   ;;  %vm42_vm2 = vcmask 126016   ;;  %s347_s0 = smov 16  }
   0xf   :  { %v51_v6 = vld [vmem:[#allocation3] sm:$0xf]  ;;  %s348_s19 = smov 28   ;;  %vm49_vm3 = vcmask 257152   ;;  %vm56_vm4 = vcmask 290048   ;;  %vm63_vm5 = vcmask 322848  }
  0x10   :  { %v79_v12 = vld [vmem:[#allocation3] sm:$0xf]  ;;  %s349_s20 = smov 56   ;;  %vm70_vm6 = vcmask 388416   ;;  %vm77_vm7 = vcmask 519552   ;;  %vm84_vm8 = vcmask 552448  }
  0x11   :  { %vm91_vm9 = vcmask 585248   ;;  %v107_v20 = vld [vmem:[#allocation3] sm:$0xf]  ;;  %s350_s21 = smov 84   ;;  %vm98_vm10 = vcmask 650816   ;;  %vm105_vm11 = vcmask 781952  }
  0x12   :  { %vm112_vm12 = vcmask 814848   ;;  %vm119_vm13 = vcmask 847648   ;;  %vm126_vm14 = vcmask 913216   ;;  %vm133_vm15 = vcmask 1044352   ;;  %v272_v31 = vld [vmem:[%s424_s1] ss:$0 sm:$0xff] }
  0x13   :  { %v273_v33 = vld [vmem:[%s425_s2] ss:$0 sm:$0xff]  ;;  %v351_v46 = vmov 683565275   ;;  %v352_v48 = vmov 2475754826  }
  0x14   :  { %v353_v51 = vmov 2131351028   ;;  %v354_v54 = vmov 2102212464   ;;  %v355_v57 = vmov 920167782  }
  0x15   :  { %v30_v1 = vld [vmem:[#allocation2] sm:$0xf]  ;;  %v356_v60 = vmov 1326507024   ;;  %s357_s1 = smov [#allocation6]  }
  0x16   :  { %32 = vrot.lane.b32.xlu0 %v30_v1, %s345_s17  ;;  %s263_s2 = sshll.u32 %s357_s1, 4  ;;  %s264_s2 = int_to_ptr.vmem [resolvable:$true] %s263_s2 }
  0x17   :  { %s320_s26 = scalar_lea.vmem %s264_s2, 64  ;;  %p325_p6 = scmp.lt.s32.totalorder %s264_s2, %s264_s2 }
  0x18   :  { %p321_p5 = scmp.ne.s32.totalorder %s264_s2, %s320_s26  ;;  %p326_p7 = scmp.lt.s32.totalorder %s320_s26, %s320_s26 }
  0x1a   :  { %p327_p8 = por %p326_p7, %p325_p6 }
  0x1c   :  { %p328_p9 = pnand %p327_p8, %p321_p5 }
  0x88   :  { %v33_v2 = vpop.permute.xlu0 %32 }
  0x89   :  { %36 = vst.msk [vmem:[#allocation2] sm:$0xf] %vm35_vm1, %v33_v2 }
  0x90   :  { %v37_v3 = vld [vmem:[#allocation2] sm:$0xf] }
  0x91   :  { %39 = vrot.lane.b32.xlu0 %v37_v3, %s346_s18 }
 0x103   :  { %v40_v4 = vpop.permute.xlu0 %39 }
 0x104   :  { %43 = vst.msk [vmem:[#allocation2] sm:$0xf] %vm42_vm2, %v40_v4 }
 0x10b   :  { %v44_v5 = vld [vmem:[#allocation2] sm:$0xf] }
 0x10c   :  { %46 = vrot.lane.b32.xlu1 %v44_v5, %s347_s0 }
 0x110   :  { %53 = vrot.lane.b32.xlu1 %v51_v6, %s348_s19 }
 0x17e   :  { %v47_v7 = vpop.permute.xlu1 %46 }
 0x17f   :  { %50 = vst.msk [vmem:[#allocation2] sm:$0xf] %vm49_vm3, %v47_v7 }
 0x182   :  { %v54_v8 = vpop.permute.xlu1 %53 }
 0x183   :  { %57 = vst.msk [vmem:[#allocation2] sm:$0xf] %vm56_vm4, %v54_v8 }
 0x18a   :  { %v58_v9 = vld [vmem:[#allocation2] sm:$0xf] }
 0x18b   :  { %60 = vrot.lane.b32.xlu0 %v58_v9, %s345_s17 }
 0x1fd   :  { %v61_v10 = vpop.permute.xlu0 %60 }
 0x1fe   :  { %64 = vst.msk [vmem:[#allocation2] sm:$0xf] %vm63_vm5, %v61_v10 }
 0x205   :  { %v65_v11 = vld [vmem:[#allocation2] sm:$0xf] }
 0x206   :  { %67 = vrot.lane.b32.xlu1 %v65_v11, %s346_s18 }
 0x20a   :  { %81 = vrot.lane.b32.xlu1 %v79_v12, %s349_s20 }
 0x278   :  { %v68_v13 = vpop.permute.xlu1 %67 }
 0x279   :  { %71 = vst.msk [vmem:[#allocation2] sm:$0xf] %vm70_vm6, %v68_v13 }
 0x27c   :  { %v82_v15 = vpop.permute.xlu1 %81 }
 0x280   :  { %v72_v14 = vld [vmem:[#allocation2] sm:$0xf] }
 0x281   :  { %74 = vrot.lane.b32.xlu0 %v72_v14, %s347_s0 }
 0x2f3   :  { %v75_v16 = vpop.permute.xlu0 %74 }
 0x2f4   :  { %78 = vst.msk [vmem:[#allocation2] sm:$0xf] %vm77_vm7, %v75_v16 }
 0x2f5   :  { %85 = vst.msk [vmem:[#allocation2] sm:$0xf] %vm84_vm8, %v82_v15 }
 0x2fc   :  { %v86_v17 = vld [vmem:[#allocation2] sm:$0xf] }
 0x2fd   :  { %88 = vrot.lane.b32.xlu0 %v86_v17, %s345_s17 }
 0x36f   :  { %v89_v18 = vpop.permute.xlu0 %88 }
 0x370   :  { %92 = vst.msk [vmem:[#allocation2] sm:$0xf] %vm91_vm9, %v89_v18 }
 0x377   :  { %v93_v19 = vld [vmem:[#allocation2] sm:$0xf] }
 0x378   :  { %95 = vrot.lane.b32.xlu1 %v93_v19, %s346_s18 }
 0x37c   :  { %109 = vrot.lane.b32.xlu1 %v107_v20, %s350_s21 }
 0x3ea   :  { %v96_v21 = vpop.permute.xlu1 %95 }
 0x3eb   :  { %99 = vst.msk [vmem:[#allocation2] sm:$0xf] %vm98_vm10, %v96_v21 }
 0x3ee   :  { %v110_v23 = vpop.permute.xlu1 %109 }
 0x3f2   :  { %v100_v22 = vld [vmem:[#allocation2] sm:$0xf] }
 0x3f3   :  { %102 = vrot.lane.b32.xlu0 %v100_v22, %s347_s0 }
 0x465   :  { %v103_v24 = vpop.permute.xlu0 %102 }
 0x466   :  { %106 = vst.msk [vmem:[#allocation2] sm:$0xf] %vm105_vm11, %v103_v24 }
 0x467   :  { %113 = vst.msk [vmem:[#allocation2] sm:$0xf] %vm112_vm12, %v110_v23 }
 0x46e   :  { %v114_v25 = vld [vmem:[#allocation2] sm:$0xf] }
 0x46f   :  { %116 = vrot.lane.b32.xlu0 %v114_v25, %s345_s17 }
 0x4e1   :  { %v117_v26 = vpop.permute.xlu0 %116 }
 0x4e2   :  { %120 = vst.msk [vmem:[#allocation2] sm:$0xf] %vm119_vm13, %v117_v26 }
 0x4e9   :  { %v121_v27 = vld [vmem:[#allocation2] sm:$0xf] }
 0x4ea   :  { %123 = vrot.lane.b32.xlu1 %v121_v27, %s346_s18 }
 0x55c   :  { %v124_v28 = vpop.permute.xlu1 %123 }
 0x55d   :  { %127 = vst.msk [vmem:[#allocation2] sm:$0xf] %vm126_vm14, %v124_v28 }
 0x564   :  { %v128_v29 = vld [vmem:[#allocation2] sm:$0xf] }
 0x565   :  { %130 = vrot.lane.b32.xlu0 %v128_v29, %s347_s0 }
 0x5d7   :  { %v131_v30 = vpop.permute.xlu0 %130 }
 0x5d8   :  { %134 = vst.msk [vmem:[#allocation2] sm:$0xf] %vm133_vm15, %v131_v30 }
 0x5df   :  { %v135_v32 = vld [vmem:[#allocation2] sm:$0xf] }
 0x5e0   :  { %v143_v34 = vmul.f32 %v272_v31, %v135_v32 }
 0x5e2   :  { %v399_v35 = vadd.f32 %v273_v33, %v143_v34 }
 0x5e4   :  { %v155_v36 = vand.u32 2139095040, %v399_v35  ;;  %v152_v40 = vand.u32 2147483647, %v399_v35  ;;  %vm154_vm7 = vcmp.lt.s32.totalorder %v399_v35, 0  ;;  %vm244_vm12 = vweird.f32 %v399_v35 }
 0x5e6   :  { %v156_v37 = vshrl.u32 %v155_v36, 23  ;;  %v159_v43 = vand.u32 8388607, %v152_v40  ;;  %vm153_vm8 = vcmp.le.f32.partialorder %v152_v40, 0.7853982 }
 0x5e8   :  { %v274_v38 = vadd.s32 4294967169, %v156_v37  ;;  %v160_v62 = vor.u32 8388608, %v159_v43 }
 0x5ea   :  { %v162_v39 = vadd.s32 1, %v274_v38  ;;  %v200_v12 = vshll.u32 %v160_v62, 8 }
 0x5ec   :  { %vm163_vm0 = vcmp.gt.s32.totalorder %v162_v39, 0 }
 0x5ed   :  { %v164_v41 = vsel %vm163_vm0, %v162_v39, 0 }
 0x5ee   :  { %v166_v42 = vand.u32 31, %v164_v41  ;;  %v165_v45 = vshrl.u32 %v164_v41, 5 }
 0x5f0   :  { %v167_v44 = vsub.s32 32, %v166_v42  ;;  %v169_v47 = vshll.u32 %v351_v46, %v166_v42  ;;  %v172_v49 = vshll.u32 %v352_v48, %v166_v42  ;;  %v175_v53 = vshll.u32 %v353_v51, %v166_v42 }
 0x5f1   :  { %v178_v56 = vshll.u32 %v354_v54, %v166_v42  ;;  %v181_v59 = vshll.u32 %v355_v57, %v166_v42  ;;  %vm184_vm1 = vcmp.lt.s32.totalorder %v165_v45, 1  ;;  %vm187_vm2 = vcmp.lt.s32.totalorder %v165_v45, 4 }
 0x5f2   :  { %v170_v50 = vshrl.u32 %v352_v48, %v167_v44  ;;  %v173_v52 = vshrl.u32 %v353_v51, %v167_v44  ;;  %v176_v55 = vshrl.u32 %v354_v54, %v167_v44  ;;  %v179_v58 = vshrl.u32 %v355_v57, %v167_v44 }
 0x5f3   :  { %v182_v61 = vshrl.u32 %v356_v60, %v167_v44  ;;  %v168_v7 = vshrl.u32 %v351_v46, %v167_v44  ;;  %vm186_vm3 = vcmp.lt.s32.totalorder %v165_v45, 3  ;;  %vm185_vm4 = vcmp.lt.s32.totalorder %v165_v45, 2 }
 0x5f4   :  { %v171_v63 = vor.u32 %v170_v50, %v169_v47  ;;  %v174_v0 = vor.u32 %v173_v52, %v172_v49  ;;  %v177_v1 = vor.u32 %v176_v55, %v175_v53  ;;  %v180_v2 = vor.u32 %v179_v58, %v178_v56 }
 0x5f5   :  { %v183_v3 = vor.u32 %v182_v61, %v181_v59 }
 0x5f6   :  { %v189_v4 = vsel %vm187_vm2, %v177_v1, 2102212464  ;;  %v192_v5 = vsel %vm184_vm1, %v171_v63, %v174_v0  ;;  %v196_v6 = vsel %vm184_vm1, %v174_v0, %v177_v1  ;;  %v193_v8 = vsel %vm187_vm2, %v180_v2, 920167782 }
 0x5f7   :  { %v197_v9 = vsel %vm187_vm2, %v183_v3, 1326507024  ;;  %v194_v10 = vsel %vm186_vm3, %v177_v1, %v193_v8  ;;  %v188_v13 = vsel %vm184_vm1, %v168_v7, %v171_v63  ;;  %v190_v14 = vsel %vm186_vm3, %v174_v0, %v189_v4 }
 0x5f8   :  { %v198_v11 = vsel %vm186_vm3, %v180_v2, %v197_v9  ;;  %v195_v15 = vsel %vm185_vm4, %v192_v5, %v194_v10  ;;  %v191_v21 = vsel %vm185_vm4, %v188_v13, %v190_v14 }
 0x5f9   :  { %v199_v16 = vsel %vm185_vm4, %v196_v6, %v198_v11  ;;  %v408_v19 = vmul.u32.u64.low %v200_v12, %v195_v15  ;;  %v409_v20 = vmul.u32.u64.high %v200_v12, %v195_v15, %v408_v19  ;;  %v207_v23 = vmul.u32 %v200_v12, %v191_v21 }
 0x5fa   :  { %v405_v17 = vmul.u32.u64.low %v200_v12, %v199_v16  ;;  %v406_v18 = vmul.u32.u64.high %v200_v12, %v199_v16, %v405_v17 }
 0x5fb   :  { %v210_v22 = vadd.s32 1, %v409_v20 }
 0x5fc   :  { %vm209_vm5 = vc.u32 %v406_v18, %v408_v19  ;;  %v208_v36 = vadd.s32 %v408_v19, %v406_v18 }
 0x5fd   :  { %v211_v24 = vsel %vm209_vm5, %v210_v22, %v409_v20 }
 0x5fe   :  { %v212_v25 = vadd.s32 %v211_v24, %v207_v23 }
 0x600   :  { %v213_v26 = vadd.s32 536870912, %v212_v25 }
 0x602   :  { %v214_v27 = vshrl.u32 %v213_v26, 30 }
 0x604   :  { %v215_v28 = vshll.u32 %v214_v27, 30  ;;  %v238_v50 = vsub.s32 4, %v214_v27 }
 0x606   :  { %v216_v29 = vsub.s32 %v212_v25, %v215_v28  ;;  %v239_v53 = vsel %vm154_vm7, %v238_v50, %v214_v27 }
 0x607   :  { %v241_v54 = vsel %vm153_vm8, 0, %v239_v53 }
 0x608   :  { %v218_v30 = vsub.s32 0, %v216_v29  ;;  %v245_v55 = vadd.s32 3, %v241_v54 }
 0x60a   :  { %v275_v31 = vmin.u32 %v218_v30, %v216_v29  ;;  %v246_v56 = vand.u32 3, %v245_v55 }
 0x60c   :  { %v220_v32 = vclz %v275_v31  ;;  %vm251_vm9 = vcmp.eq.s32.totalorder %v246_v56, 2  ;;  %vm248_vm10 = vcmp.eq.s32.totalorder %v246_v56, 0  ;;  %vm247_vm11 = vcmp.lt.s32.totalorder %v246_v56, 2 }
 0x60e   :  { %v276_v33 = vadd.s32 4294967294, %v220_v32 }
 0x610   :  { %vm277_vm6 = vcmp.lt.s32.totalorder %v276_v33, 0 }
 0x611   :  { %v223_v34 = vsel %vm277_vm6, 0, %v276_v33 }
 0x612   :  { %v224_v37 = vsub.s32 32, %v223_v34  ;;  %v228_v38 = vsub.s32 4294967266, %v223_v34  ;;  %v225_v39 = vshll.u32 %v216_v29, %v223_v34 }
 0x614   :  { %v226_v41 = vshrl.u32 %v208_v36, %v224_v37  ;;  %v229_v42 = vadd.s32 127, %v228_v38 }
 0x616   :  { %v227_v43 = vor.u32 %v226_v41, %v225_v39  ;;  %v230_v44 = vshll.u32 %v229_v42, 23 }
 0x618   :  { %v231_v45 = vor.u32 4788187, %v230_v44  ;;  %v234_v47 = vcvt.s32.f32 %v227_v43 }
 0x61a   :  { %v232_v46 = vand.u32 2147483647, %v231_v45 }
 0x61c   :  { %v235_v48 = vmul.f32 %v234_v47, %v232_v46 }
 0x61e   :  { %v236_v49 = vxor.u32 2147483648, %v235_v48 }
 0x620   :  { %v237_v51 = vsel %vm154_vm7, %v236_v49, %v235_v48 }
 0x621   :  { %v240_v52 = vsel %vm153_vm8, %v399_v35, %v237_v51 }
 0x622   :  { %296 = vcosq.f32 %v240_v52 }
 0x623   :  { %298 = vsinq.f32 %v240_v52 }
 0x62f   :  { %v297_v57 = vpop.eup %296 }
 0x630   :  { %v299_v58 = vpop.eup %298  ;;  %v252_v59 = vxor.u32 2147483648, %v297_v57 }
 0x631   :  { %v249_v60 = vxor.u32 2147483648, %v299_v58 }
 0x632   :  { %v253_v61 = vsel %vm251_vm9, %v252_v59, %v299_v58 }
 0x633   :  { %v250_v40 = vsel %vm248_vm10, %v297_v57, %v249_v60 }
 0x634   :  { %v254_v62 = vsel %vm247_vm11, %v250_v40, %v253_v61 }
 0x635   :  { %v255_v63 = vsel %vm244_vm12, nan, %v254_v62 }
 0x636   :  { %256 = vst [vmem:[#allocation6] sm:$0xf] %v255_v63 }
 0x637   :  { %331 = shalt.err (!%p328_p9)
}
 0x638   :  { %266 = dma.vmem_to_hbm [thread:$0]  %s264_s2, 64, %s426_s3, [#allocation5]  }
 0x639   :  { %342 = dma.done.wait [#allocation5], 64  }
 0x63a   :  { %343 = vsyncadd [#allocation5], 4294967232 }
 0x63b   :  { %270 = vsyncpa [#allocation4], 1 }
 0x63c   :  { %271 = vsyncpa [#allocation5], 1 }

</bundles_post_ra>
